<compile_context>
chip_gen: v5e
topology: v5e:2x2
jax: 0.10.0
libtpu: 0.0.40
codegen_flags: <defaults>
</compile_context>

<pallas_src>
import math
from functools import partial

import jax
import jax.numpy as jnp
from jax import lax
from jax.experimental import pallas as pl
from jax.experimental.pallas import tpu as pltpu

EPS = 1e-5  # nn.LayerNorm default
LANE = 128


def _preact_upconv_kernel(x_ref, gamma_ref, beta_ref, w_ref, b_ref, o_ref,
                          *, fuse_taps, approx_gelu):
    # x_ref:     (TM, Cin)                      TM = TR*W flattened pixels (channels last)
    # gamma/beta:(1, Cin)                       LayerNorm affine params
    # w_ref:     fused:   (Cin, kH*kW*Cout)     w[ic, (kh*kW + kw)*Cout + oc]
    #            per-kh:  (kH, Cin, kW*Cout)    w[kh, ic, kw*Cout + oc]
    # b_ref:     (1, kH*kW*Cout) or (1, kW*Cout)   bias replicated per tap
    # o_ref:     (TR, kH, W, kW*Cout)           row-major == (n, h, kh, w, kw, oc)
    tr, n_kh, w_pix, c2 = o_ref.shape

    x = x_ref[...].astype(jnp.float32)

    # LayerNorm over channels, one-pass stats: var = E[x^2] - mean^2 (the two cross-lane
    # reductions are independent and pipeline on the XLU).  Biased variance, like PyTorch.
    mean = jnp.mean(x, axis=-1, keepdims=True)
    mean_sq = jnp.mean(x * x, axis=-1, keepdims=True)
    var = jnp.maximum(mean_sq - mean * mean, 0.0)
    xn = (x - mean) * lax.rsqrt(var + EPS)
    xn = xn * gamma_ref[...].astype(jnp.float32) + beta_ref[...].astype(jnp.float32)

    if approx_gelu:
        # tanh approximation runs on the otherwise-idle EUP slot; optional (changes numerics).
        c = math.sqrt(2.0 / math.pi)
        h = 0.5 * xn * (1.0 + jnp.tanh(c * (xn + 0.044715 * xn * xn * xn)))
    else:
        # Exact erf GELU: matches torch.nn.GELU default.
        h = 0.5 * xn * (1.0 + lax.erf(xn * (1.0 / math.sqrt(2.0))))

    # Feed the MXU in the weight dtype (bf16 path by default), accumulate in f32.
    if w_ref.dtype != jnp.float32:
        h = h.astype(w_ref.dtype)

    b = b_ref[...].astype(jnp.float32)

    if fuse_taps:
        # Single (TM, Cin) x (Cin, kH*kW*Cout) matmul; the two 2*Cout halves are
        # lane-aligned (2*Cout % 128 == 0), so the per-kh slice + leading-dim reshape
        # is free before the lane-dense store.
        y = jnp.dot(h, w_ref[...], preferred_element_type=jnp.float32) + b
        for kh in range(n_kh):
            o_ref[:, kh, :, :] = (
                y[:, kh * c2:(kh + 1) * c2].reshape(tr, w_pix, c2).astype(o_ref.dtype))
    else:
        # Fallback: one matmul per kh tap (no lane-slicing needed).
        for kh in range(n_kh):
            y = jnp.dot(h, w_ref[kh], preferred_element_type=jnp.float32) + b
            o_ref[:, kh, :, :] = y.reshape(tr, w_pix, c2).astype(o_ref.dtype)


def _vmem_budgets():
    """Generation-aware (scoped VMEM limit, per-tile byte budget)."""
    try:
        cap = pltpu.get_tpu_info().vmem_capacity_bytes
    except Exception:
        cap = 64 * 1024 * 1024  # conservative default (v7x-class)
    if cap <= 64 * 1024 * 1024:          # v7x: 64 MiB physical per TensorCore
        return 40 * 1024 * 1024, 14 * 1024 * 1024
    return 64 * 1024 * 1024, 24 * 1024 * 1024   # v5e / v6e: 128 MiB physical


def _choose_tile_rows(R, sub, tr_budget, min_steps=8):
    """Pick super-rows per grid step.

    Constraints / preferences (in order):
      * tr is a multiple of `sub` so TM = tr*W is sublane-aligned for the input dtype,
      * at least ~min_steps grid steps (DMA pipelining + v7x dual-TC sharding),
      * tr divides R when possible (avoids a whole-input jnp.pad HBM pass),
      * even number of grid steps (balanced v7x TensorCore split),
      * otherwise the largest tile under the VMEM budget.
    """
    tr_cap = max(sub, min(tr_budget, R))
    tr_cap = min(tr_cap, max(sub, -(-R // min_steps)))
    tr_cap = max(sub, (tr_cap // sub) * sub)
    best_key, best_tr = None, sub
    for tr in range(tr_cap, 0, -sub):
        n = -(-R // tr)
        pad = n * tr - R
        even = (n % 2 == 0) or n == 1
        key = (pad == 0, even, tr)
        if best_key is None or key > best_key:
            best_key, best_tr = key, tr
    return best_tr


def preact_upconv_block(x, gamma, beta, weight, bias, *,
                        channels_last_in=False, channels_last_out=False,
                        out_dtype=None, mxu_dtype=jnp.bfloat16,
                        approx_gelu=False):
    """Fused LayerNorm2d -> GELU -> ConvTranspose2d(k=2, s=2).

    x: [N, Cin, H, W] (or [N, H, W, Cin] if channels_last_in); weight: [Cin, Cout, 2, 2]
    (PyTorch ConvTranspose2d layout); gamma/beta: [Cin]; bias: [Cout].
    Returns [N, Cout, 2H, 2W] (or [N, 2H, 2W, Cout] if channels_last_out — recommended in
    an NHWC pipeline: it removes a full HBM read+write pass over the 4x-upsampled output).
    out_dtype=jnp.bfloat16 halves the dominant output writeback; default keeps x's dtype
    for exact parity with the PyTorch module.
    """
    if channels_last_in:
        N, H, W, Cin = x.shape
        x_rows = x.reshape(N * H * W, Cin)
    else:
        N, Cin, H, W = x.shape
        # Input-side HBM pass only for the NCHW PyTorch interface (see module TODO).
        x_rows = jnp.transpose(x, (0, 2, 3, 1)).reshape(N * H * W, Cin)

    Cin_w, Cout, kH, kW = weight.shape
    assert (kH, kW) == (2, 2) and Cin_w == Cin
    out_dtype = x.dtype if out_dtype is None else jnp.dtype(out_dtype)
    mxu_dtype = weight.dtype if mxu_dtype is None else jnp.dtype(mxu_dtype)

    # ---- Weight / bias packing ------------------------------------------------------
    fuse_taps = (kW * Cout) % LANE == 0   # 2*Cout lane-aligned -> free per-kh lane slice
    if fuse_taps:
        # w_pack[ic, (kh*kW + kw)*Cout + oc] = weight[ic, oc, kh, kw]
        w_pack = jnp.transpose(weight, (0, 2, 3, 1)).reshape(Cin, kH * kW * Cout)
        b_pack = jnp.tile(bias.astype(jnp.float32), (kH * kW,)).reshape(1, kH * kW * Cout)
        w_spec = pl.BlockSpec((Cin, kH * kW * Cout), lambda i: (0, 0))
        b_spec = pl.BlockSpec((1, kH * kW * Cout), lambda i: (0, 0))
    else:
        # w_pack[kh, ic, kw*Cout + oc] = weight[ic, oc, kh, kw]
        w_pack = jnp.transpose(weight, (2, 0, 3, 1)).reshape(kH, Cin, kW * Cout)
        b_pack = jnp.tile(bias.astype(jnp.float32), (kW,)).reshape(1, kW * Cout)
        w_spec = pl.BlockSpec((kH, Cin, kW * Cout), lambda i: (0, 0, 0))
        b_spec = pl.BlockSpec((1, kW * Cout), lambda i: (0, 0))
    w_pack = w_pack.astype(mxu_dtype)     # bf16 MXU feed by default (f32 accumulation kept)
    gamma2 = gamma.reshape(1, Cin)
    beta2 = beta.reshape(1, Cin)

    # ---- Tile-size selection --------------------------------------------------------
    vmem_limit, tile_budget = _vmem_budgets()
    in_item = jnp.dtype(x_rows.dtype).itemsize
    out_item = jnp.dtype(out_dtype).itemsize
    pad_l = lambda c: -(-c // LANE) * LANE
    # dtype-aware sublane alignment of TM = tr*W: f32 -> 8, bf16 -> 16, int8/fp8 -> 32.
    sublane_mult = max(8, 32 // in_item)
    sub = sublane_mult // math.gcd(W, sublane_mult)
    # in + out tile bytes per super-row (lane-padded VMEM footprint).
    bytes_per_superrow = W * (in_item * pad_l(Cin) + kH * out_item * pad_l(kW * Cout))
    # /4 margin: double-buffered in/out tiles plus in-kernel f32 temporaries.
    tr_budget = max(1, tile_budget // (4 * bytes_per_superrow))

    R = N * H
    tr = _choose_tile_rows(R, sub, tr_budget)
    n_tiles = -(-R // tr)
    R_pad = n_tiles * tr
    if R_pad != R:
        # Fallback only when no divisor-of-R tile exists (costs one extra HBM pass over
        # the input).  Padded rows produce garbage (LN of zeros -> beta -> GELU -> matmul)
        # that is sliced off with out[:R] below — do NOT remove that slice.
        x_rows = jnp.pad(x_rows, ((0, (R_pad - R) * W), (0, 0)))
    TM = tr * W

    kernel = partial(_preact_upconv_kernel, fuse_taps=fuse_taps, approx_gelu=approx_gelu)
    out = pl.pallas_call(
        kernel,
        out_shape=jax.ShapeDtypeStruct((R_pad, kH, W, kW * Cout), out_dtype),
        grid_spec=pltpu.PrefetchScalarGridSpec(
            num_scalar_prefetch=0,
            grid=(n_tiles,),
            in_specs=[
                pl.BlockSpec((TM, Cin), lambda i: (i, 0)),
                pl.BlockSpec((1, Cin), lambda i: (0, 0)),
                pl.BlockSpec((1, Cin), lambda i: (0, 0)),
                w_spec,
                b_spec,
            ],
            out_specs=pl.BlockSpec((tr, kH, W, kW * Cout), lambda i: (i, 0, 0, 0)),
        ),
        compiler_params=pltpu.CompilerParams(
            dimension_semantics=("parallel",),  # shards the grid across v7x's 2 TensorCores
            vmem_limit_bytes=vmem_limit,
        ),
    )(x_rows, gamma2, beta2, w_pack, b_pack)

    # (R, 2, W, 2*Cout) is row-major identical to (N, 2H, 2W, Cout): pure (free) reshape.
    out = out[:R].reshape(N, kH * H, kW * W, Cout)
    if channels_last_out:
        return out
    # NHWC -> NCHW only for the PyTorch-facing interface (one HBM pass over the 4x output;
    # prefer channels_last_out=True when the consumer accepts NHWC).
    return jnp.transpose(out, (0, 3, 1, 2))


def _reference(x_nchw, gamma, beta, weight, bias):
    """Pure-JAX reference mirroring the PyTorch module semantics (f32)."""
    x = x_nchw.astype(jnp.float32)
    mean = jnp.mean(x, axis=1, keepdims=True)
    var = jnp.mean((x - mean) ** 2, axis=1, keepdims=True)
    xn = (x - mean) / jnp.sqrt(var + EPS)
    xn = xn * gamma[None, :, None, None] + beta[None, :, None, None]
    h = 0.5 * xn * (1.0 + lax.erf(xn / math.sqrt(2.0)))
    y = jnp.einsum("nchw,cokl->nhwklo", h, weight)  # (N,H,W,kH,kW,Cout)
    N, H, W, kH, kW, Cout = y.shape
    y = jnp.transpose(y, (0, 5, 1, 3, 2, 4)).reshape(N, Cout, H * kH, W * kW)
    return y + bias[None, :, None, None]


if __name__ == "__main__":
    key = jax.random.PRNGKey(0)
    N, Cin, H, W = 2, 32, 16, 16
    Cout = 64  # Cout >= 64 -> 2*Cout >= 128 -> fused taps + fully lane-dense stores

    k1, k2, k3, k4, k5 = jax.random.split(key, 5)
    x = jax.random.normal(k1, (N, Cin, H, W), dtype=jnp.float32)
    gamma = 1.0 + 0.1 * jax.random.normal(k2, (Cin,), dtype=jnp.float32)
    beta = 0.1 * jax.random.normal(k3, (Cin,), dtype=jnp.float32)
    weight = 0.1 * jax.random.normal(k4, (Cin, Cout, 2, 2), dtype=jnp.float32)
    bias = 0.1 * jax.random.normal(k5, (Cout,), dtype=jnp.float32)

    ref = _reference(x, gamma, beta, weight, bias)

    # 1) Exact-parity path: f32 MXU feed, f32 output, NCHW out (PyTorch semantics).
    fwd_exact = jax.jit(partial(preact_upconv_block, mxu_dtype=jnp.float32))
    out = jax.block_until_ready(fwd_exact(x, gamma, beta, weight, bias))
    assert out.shape == (N, Cout, 2 * H, 2 * W), out.shape
    assert jnp.allclose(out, ref, atol=1e-4, rtol=1e-4), float(jnp.max(jnp.abs(out - ref)))

    # 2) Fast path: bf16 MXU feed (default), bf16 output, channels-last output
    #    (no output-side transpose).  Looser tolerance because of the bf16 matmul/store.
    fwd_fast = jax.jit(partial(preact_upconv_block,
                               out_dtype=jnp.bfloat16, channels_last_out=True))
    out_fast = jax.block_until_ready(fwd_fast(x, gamma, beta, weight, bias))
    assert out_fast.shape == (N, 2 * H, 2 * W, Cout), out_fast.shape
    ref_nhwc = jnp.transpose(ref, (0, 2, 3, 1))
    err = jnp.max(jnp.abs(out_fast.astype(jnp.float32) - ref_nhwc))
    assert jnp.allclose(out_fast.astype(jnp.float32), ref_nhwc, atol=3e-2, rtol=3e-2), float(err)

    print("KERNEL_OK")
</pallas_src>

<mosaic_0001>
module attributes {stable_mosaic.version = 11 : i64} {
  func.func @_preact_upconv_kernel(%arg0: i32, %arg1: memref<64x32xf32, #tpu.memory_space<vmem>>, %arg2: memref<1x32xf32, #tpu.memory_space<vmem>>, %arg3: memref<1x32xf32, #tpu.memory_space<vmem>>, %arg4: memref<32x256xf32, #tpu.memory_space<vmem>>, %arg5: memref<1x256xf32, #tpu.memory_space<vmem>>, %arg6: memref<4x2x16x128xf32, #tpu.memory_space<vmem>>) attributes {dimension_semantics = [#tpu.dimension_semantics<parallel>], iteration_bounds = array<i64: 8>, scalar_prefetch = 0 : i64, scratch_operands = 0 : i64, tpu.core_type = #tpu.core_type<tc>, window_params = [{transform_indices = @transform_0, window_bounds = array<i64: 64, 32>}, {pipeline_mode = #tpu.pipeline_mode<synchronous>, transform_indices = @transform_1, window_bounds = array<i64: 1, 32>}, {pipeline_mode = #tpu.pipeline_mode<synchronous>, transform_indices = @transform_2, window_bounds = array<i64: 1, 32>}, {pipeline_mode = #tpu.pipeline_mode<synchronous>, transform_indices = @transform_3, window_bounds = array<i64: 32, 256>}, {pipeline_mode = #tpu.pipeline_mode<synchronous>, transform_indices = @transform_4, window_bounds = array<i64: 1, 256>}, {transform_indices = @transform_5, window_bounds = array<i64: 4, 2, 16, 128>}]} {
    %c0 = arith.constant 0 : index
    %c0_0 = arith.constant 0 : index
    %0 = vector.load %arg1[%c0, %c0_0] : memref<64x32xf32, #tpu.memory_space<vmem>>, vector<64x32xf32>
    %cst = arith.constant dense<0.000000e+00> : vector<64xf32>
    %1 = vector.multi_reduction <add>, %0, %cst [1] : vector<64x32xf32> to vector<64xf32>
    %2 = vector.shape_cast %1 : vector<64xf32> to vector<64x1xf32>
    %cst_1 = arith.constant 3.200000e+01 : f32
    %3 = vector.broadcast %cst_1 : f32 to vector<64x1xf32>
    %4 = arith.divf %2, %3 : vector<64x1xf32>
    %5 = arith.mulf %0, %0 : vector<64x32xf32>
    %cst_2 = arith.constant dense<0.000000e+00> : vector<64xf32>
    %6 = vector.multi_reduction <add>, %5, %cst_2 [1] : vector<64x32xf32> to vector<64xf32>
    %7 = vector.shape_cast %6 : vector<64xf32> to vector<64x1xf32>
    %cst_3 = arith.constant 3.200000e+01 : f32
    %8 = vector.broadcast %cst_3 : f32 to vector<64x1xf32>
    %9 = arith.divf %7, %8 : vector<64x1xf32>
    %10 = arith.mulf %4, %4 : vector<64x1xf32>
    %11 = arith.subf %9, %10 : vector<64x1xf32>
    %cst_4 = arith.constant 0.000000e+00 : f32
    %12 = vector.broadcast %cst_4 : f32 to vector<64x1xf32>
    %13 = arith.maximumf %11, %12 : vector<64x1xf32>
    %14 = vector.broadcast %4 : vector<64x1xf32> to vector<64x32xf32>
    %15 = arith.subf %0, %14 : vector<64x32xf32>
    %cst_5 = arith.constant 9.99999974E-6 : f32
    %16 = vector.broadcast %cst_5 : f32 to vector<64x1xf32>
    %17 = arith.addf %13, %16 : vector<64x1xf32>
    %18 = math.rsqrt %17 : vector<64x1xf32>
    %19 = vector.broadcast %18 : vector<64x1xf32> to vector<64x32xf32>
    %20 = arith.mulf %15, %19 : vector<64x32xf32>
    %c0_6 = arith.constant 0 : index
    %c0_7 = arith.constant 0 : index
    %21 = vector.load %arg2[%c0_6, %c0_7] : memref<1x32xf32, #tpu.memory_space<vmem>>, vector<1x32xf32>
    %22 = vector.broadcast %21 : vector<1x32xf32> to vector<64x32xf32>
    %23 = arith.mulf %20, %22 : vector<64x32xf32>
    %c0_8 = arith.constant 0 : index
    %c0_9 = arith.constant 0 : index
    %24 = vector.load %arg3[%c0_8, %c0_9] : memref<1x32xf32, #tpu.memory_space<vmem>>, vector<1x32xf32>
    %25 = vector.broadcast %24 : vector<1x32xf32> to vector<64x32xf32>
    %26 = arith.addf %23, %25 : vector<64x32xf32>
    %cst_10 = arith.constant 5.000000e-01 : f32
    %27 = vector.broadcast %cst_10 : f32 to vector<64x32xf32>
    %28 = arith.mulf %27, %26 : vector<64x32xf32>
    %cst_11 = arith.constant 0.707106769 : f32
    %29 = vector.broadcast %cst_11 : f32 to vector<64x32xf32>
    %30 = arith.mulf %26, %29 : vector<64x32xf32>
    %31 = math.erf %30 : vector<64x32xf32>
    %cst_12 = arith.constant 1.000000e+00 : f32
    %32 = vector.broadcast %cst_12 : f32 to vector<64x32xf32>
    %33 = arith.addf %32, %31 : vector<64x32xf32>
    %34 = arith.mulf %28, %33 : vector<64x32xf32>
    %c0_13 = arith.constant 0 : index
    %c0_14 = arith.constant 0 : index
    %35 = vector.load %arg5[%c0_13, %c0_14] : memref<1x256xf32, #tpu.memory_space<vmem>>, vector<1x256xf32>
    %c0_15 = arith.constant 0 : index
    %c0_16 = arith.constant 0 : index
    %36 = vector.load %arg4[%c0_15, %c0_16] : memref<32x256xf32, #tpu.memory_space<vmem>>, vector<32x256xf32>
    %cst_17 = arith.constant dense<0.000000e+00> : vector<64x256xf32>
    %37 = tpu.matmul %34, %36, %cst_17 {dimension_numbers = #tpu.dot_dimension_numbers<[1], [0], [0], [1], [0, 0, 1, 1], [], []>} : vector<64x32xf32>, vector<32x256xf32>, vector<64x256xf32> -> vector<64x256xf32>
    %38 = vector.broadcast %35 : vector<1x256xf32> to vector<64x256xf32>
    %39 = arith.addf %37, %38 : vector<64x256xf32>
    %40 = vector.extract_strided_slice %39 {offsets = [0, 0], sizes = [64, 128], strides = [1, 1]} : vector<64x256xf32> to vector<64x128xf32>
    %41 = vector.shape_cast %40 : vector<64x128xf32> to vector<4x16x128xf32>
    %c0_18 = arith.constant 0 : index
    %c0_19 = arith.constant 0 : index
    %c0_20 = arith.constant 0 : index
    %c0_21 = arith.constant 0 : index
    %42 = vector.load %arg6[%c0_18, %c0_19, %c0_20, %c0_21] : memref<4x2x16x128xf32, #tpu.memory_space<vmem>>, vector<4x1x16x128xf32>
    %43 = vector.shape_cast %42 : vector<4x1x16x128xf32> to vector<4x16x128xf32>
    %44 = vector.shape_cast %41 : vector<4x16x128xf32> to vector<4x1x16x128xf32>
    tpu.vector_store %arg6[%c0_18, %c0_19, %c0_20, %c0_21], %44 {strides = array<i32>} : memref<4x2x16x128xf32, #tpu.memory_space<vmem>>, vector<4x1x16x128xf32>,
    %45 = vector.extract_strided_slice %39 {offsets = [0, 128], sizes = [64, 128], strides = [1, 1]} : vector<64x256xf32> to vector<64x128xf32>
    %46 = vector.shape_cast %45 : vector<64x128xf32> to vector<4x16x128xf32>
    %c0_22 = arith.constant 0 : index
    %c1 = arith.constant 1 : index
    %c0_23 = arith.constant 0 : index
    %c0_24 = arith.constant 0 : index
    %47 = vector.load %arg6[%c0_22, %c1, %c0_23, %c0_24] : memref<4x2x16x128xf32, #tpu.memory_space<vmem>>, vector<4x1x16x128xf32>
    %48 = vector.shape_cast %47 : vector<4x1x16x128xf32> to vector<4x16x128xf32>
    %49 = vector.shape_cast %46 : vector<4x16x128xf32> to vector<4x1x16x128xf32>
    tpu.vector_store %arg6[%c0_22, %c1, %c0_23, %c0_24], %49 {strides = array<i32>} : memref<4x2x16x128xf32, #tpu.memory_space<vmem>>, vector<4x1x16x128xf32>,
    return
  }
  func.func @transform_0(%arg0: i32) -> (i32, i32) {
    %c0_i32 = arith.constant 0 : i32
    %c0_i32_0 = arith.constant 0 : i32
    return %arg0, %c0_i32 : i32, i32
  }
  func.func @transform_1(%arg0: i32) -> (i32, i32) {
    %c0_i32 = arith.constant 0 : i32
    %c0_i32_0 = arith.constant 0 : i32
    %c0_i32_1 = arith.constant 0 : i32
    return %c0_i32, %c0_i32_0 : i32, i32
  }
  func.func @transform_2(%arg0: i32) -> (i32, i32) {
    %c0_i32 = arith.constant 0 : i32
    %c0_i32_0 = arith.constant 0 : i32
    %c0_i32_1 = arith.constant 0 : i32
    return %c0_i32, %c0_i32_0 : i32, i32
  }
  func.func @transform_3(%arg0: i32) -> (i32, i32) {
    %c0_i32 = arith.constant 0 : i32
    %c0_i32_0 = arith.constant 0 : i32
    %c0_i32_1 = arith.constant 0 : i32
    return %c0_i32, %c0_i32_0 : i32, i32
  }
  func.func @transform_4(%arg0: i32) -> (i32, i32) {
    %c0_i32 = arith.constant 0 : i32
    %c0_i32_0 = arith.constant 0 : i32
    %c0_i32_1 = arith.constant 0 : i32
    return %c0_i32, %c0_i32_0 : i32, i32
  }
  func.func @transform_5(%arg0: i32) -> (i32, i32, i32, i32) {
    %c0_i32 = arith.constant 0 : i32
    %c0_i32_0 = arith.constant 0 : i32
    %c0_i32_1 = arith.constant 0 : i32
    %c0_i32_2 = arith.constant 0 : i32
    return %arg0, %c0_i32, %c0_i32_0, %c0_i32_1 : i32, i32, i32, i32
  }
}

</mosaic_0001>

<bundles_post_ra>
// kernel: tile.9
= control target key start
LH: loop header
LB: loop body
LE: loop exit
PB: predicated region body
PF: predicated region fallthrough
CT: control target
= control target key end

     0   :  { %s6_s8 = smov 3  ;;  %vm8_vm0 = vcmask 523264   ;;  %s31_s9 = smov 64   ;;  %vm15_vm1 = vcmask 1048064   ;;  %s51_s0 = inlined_call_operand.vmem [shape: f32[4,64], index: 0, kind: input, shape index: {}]   ;;  %s52_s1 = inlined_call_operand.vmem [shape: f32[1,256], index: 1, kind: output, shape index: {}]  }
   0x1   :  { %v4_v0 = vld [vmem:[%s51_s0] sm:$0xf]  ;;  %s11_s0 = smov 3 }
   0x2   :  { %5 = vst [vmem:[#allocation1] sm:$0xf] %v4_v0 }
   0x9   :  { %v12_v1 = vld [vmem:[#allocation1 + $0x1] ss:$2 sm:%s11_s0]   ;;  %v7_v2 = vld [vmem:[#allocation1] ss:$2 sm:%s6_s8]  }
   0xa   :  { %13 = vrot.lane.b32.xlu0 %v12_v1, %s31_s9  ;;  %9 = vst.msk [vmem:[#allocation0] ss:$8 sm:$0x3] %vm8_vm0, %v7_v2  }
  0x7c   :  { %v14_v3 = vpop.permute.xlu0 %13  }
  0x7d   :  { %16 = vst.msk [vmem:[#allocation0] ss:$8 sm:$0x3] %vm15_vm1, %v14_v3  }
  0x84   :  { %v19_v4 = vld [vmem:[#allocation0] sm:$0x1]  ;;  %v24_v5 = vld [vmem:[#allocation0 + $0x8] sm:$0x1] }
  0x85   :  { %22 = vst [vmem:[%s52_s1] sm:$0x1] %v19_v4 }
  0x86   :  { %29 = vst [vmem:[%s52_s1 + $0x1] sm:$0x1] %v24_v5 }

// kernel: tile.8
= control target key start
LH: loop header
LB: loop body
LE: loop exit
PB: predicated region body
PF: predicated region fallthrough
CT: control target
= control target key end

     0   :  { %s22_s0 = inlined_call_operand.vmem [shape: f32[64], index: 0, kind: input, shape index: {}]   ;;  %s23_s1 = inlined_call_operand.vmem [shape: f32[4,64], index: 1, kind: output, shape index: {}]  }
   0x1   :  { %v4_v0 = vld [vmem:[%s22_s0] ss:$0 sm:$0xff] }
   0x2   :  { %5 = vst [vmem:[%s23_s1] sm:$0xf] %v4_v0 }

// kernel: preact_upconv_block.1
= control target key start
LH: loop header
LB: loop body
LE: loop exit
PB: predicated region body
PF: predicated region fallthrough
CT: control target
= control target key end

     0   :  { %10 = vsyncpa [#allocation3], 0  ;;  %s1973_s0 = inlined_call_operand.hbm [shape: f32[512,32], index: 0, kind: input, shape index: {}]   ;;  %s1974_s1 = inlined_call_operand.vmem [shape: f32[1,32], index: 1, kind: input, shape index: {}]   ;;  %s1975_s2 = inlined_call_operand.vmem [shape: f32[1,32], index: 2, kind: input, shape index: {}]   ;;  %s1976_s3 = inlined_call_operand.vmem [shape: f32[32,256], index: 3, kind: input, shape index: {}]   ;;  %s1977_s4 = inlined_call_operand.vmem [shape: f32[1,256], index: 4, kind: input, shape index: {}]   ;;  %s1978_s5 = inlined_call_operand.vmem [shape: f32[32,2,16,128], index: 5, kind: output, shape index: {}]  }
   0x1   :  { %12 = vsyncpa [#allocation3 + $0x1], 0  ;;  %s1282_s18 = smov 0   ;;  %s1284_s19 = smov 0  }
   0x2   :  { %s1286_s20 = smov 0   ;;  %s1288_s21 = smov 0  }
   0x3 LB: > { %s1049_s22 = sadd.s32 4294967295, %s1247_s21   ;;  %s1302_s23 = sadd.s32 1, %s1247_s21   ;;  %s1247_s21 = sphi %s1288_s21, %s2003_s21   ;;  %s1243_s20 = sphi %s1286_s20, %s2002_s20   ;;  %s1239_s19 = sphi %s1284_s19, %s2001_s19   ;;  %s1235_s18 = sphi %s1282_s18, %s2000_s18  }
   0x4   : > { %s22_s24 = ssub.s32 %s1247_s21, %s1302_s23  ;;  %s25_s25 = sadd.s32 1, %s1243_s20 }
   0x5   : > { %p23_p0 = scmp.eq.s32.totalorder %s22_s24, 0  ;;  %p32_p1 = scmp.ne.s32.totalorder %s1243_s20, %s1239_s19 }
   0x6   : > { %p33_p2 = scmp.eq.s32.totalorder %s1247_s21, 0  ;;  %p38_p3 = scmp.ne.s32.totalorder %s1239_s19, %s1235_s18 }
   0x7   : > { %s1312_s26 = scalar_select %p23_p0, %s1243_s20, %s25_s25  }
   0x8   : > { %p1314_p4 = por %p33_p2, %p32_p1  ;;  %p39_p5 = scmp.eq.s32.totalorder %s1049_s22, 0 }
   0x9   : > { %p1111_p6 = scmp.lt.s32.totalorder %s1247_s21, 8  ;;  %s184_s29 = sand.u32 1, %s1243_s20  }
   0xa   : > { %p1321_p7 = por %p39_p5, %p38_p3  ;;  %s1053_s30 = sshll.u32 %s184_s29, 6 }
   0xb   : > { %s1095_s6 = sshll.u32 %s1247_s21, 6  ;;  %s188_s10 = scalar_lea.vmem [#allocation2], %s1053_s30 }
   0xc   : > { %s193_s9 = scalar_lea.hbm %s1973_s0, %s1095_s6  ;;  %s196_s11 = sshll.u32 %s188_s10, 4  ;;  %s197_s11 = int_to_ptr.vmem [resolvable:$true] %s196_s11 }
   0xd   : > { %s194_s12 = sshll.u32 %s193_s9, 4  ;;  %p1332_p8 = pnand %p1111_p6, %p1314_p4  ;;  %s195_s12 = int_to_ptr.hbm [resolvable:$true] %s194_s12 }
   0xe   : > { %p1056_p9 = scmp.ge.s32.totalorder %s1247_s21, 1  ;;  %s185_s14 = scalar_lea.sflag [#allocation3], %s184_s29 }
   0xf   : > { %s1183_s15 = sshra.s32 %s195_s12, 4  ;;  %p1187_p11 = pneg %p1332_p8  ;;  %s1184_s15 = int_to_ptr.hbm [resolvable:$true] %s1183_s15 }
  0x10   : > { %s1185_s16 = scalar_lea.hbm %s1184_s15, 64  ;;  %s1190_s24 = scalar_lea.hbm %s1973_s0, 512 }
  0x11   : > { %p1186_p10 = scmp.ne.s32.totalorder %s1184_s15, %s1185_s16  ;;  %p1191_p0 = scmp.lt.s32.totalorder %s1184_s15, %s1973_s0 }
  0x12   : > { %p1192_p1 = scmp.lt.s32.totalorder %s1190_s24, %s1185_s16 }
  0x13   : > { %p1188_p12 = pnand %p1187_p11, %p1186_p10 }
  0x14   : > { %p1193_p2 = por %p1192_p1, %p1191_p0 }
  0x15   : > { %p1189_p13 = pneg %p1188_p12 }
  0x17   : > { %p1194_p3 = pnand %p1193_p2, %p1189_p13 }
  0x19   : > { %1197 = shalt.err (!%p1194_p3)
}
  0x1a   : > { %s1249_s29 = smov 128   ;;  %s1250_s30 = smov 8  }
  0x1b   : > { %1110 = dma.hbm_to_vmem [thread:$0]  (!%p1332_p8), %s195_s12, 1024, %s197_s11, %s185_s14, %s1249_s29, %s1249_s29, %s1250_s30  }
  0x1c   : > { %p204_p4 = scmp.lt.s32.totalorder %s1247_s21, 9 }
  0x1e   : > { %p205_p5 = pnand %p1056_p9, %p204_p4 }
  0x1f   : > { %s210_s6 = sand.u32 (!%p205_p5), 1, %s1239_s19  }
  0x20   : > { %208 = sbr.rel (%p205_p5) target bundleno = 444 (0x1bc), region = 40  ;;  %s1057_s7 = sshll.u32 (!%p205_p5), %s210_s6, 6 }
  0x21   : > { %s211_s8 = scalar_lea.sflag (!%p205_p5), [#allocation3], %s210_s6  ;;  %s1351_s9 = scalar_lea.vmem (!%p205_p5), [#allocation2], %s1057_s7 }
  0x25   : > { %1230 = dma.done.wait (%p1321_p7), %s211_s8, 1024  }
  0x26   : > { %1232 = vsyncadd (%p1321_p7), %s211_s8, 4294966272  ;;  %vm259_vm0 = vcmask 261120   ;;  %v1358_v0 = vld [vmem:[%s1351_s9 + $0x20] sm:$0xff]  ;;  %v1370_v5 = vld [vmem:[%s1351_s9 + $0x28] sm:$0xff]  ;;  %v1251_v32 = vmov 32.0   ;;  %s1058_s10 = sshll.u32 %s1049_s22, 2 }
  0x27   : > { %v1361_v1 = vld [vmem:[%s1351_s9] sm:$0xff]  ;;  %v272_v2 = vsel %vm259_vm0, %v1358_v0, 0.0  ;;  %v303_v7 = vmul.f32 %v1358_v0, %v1358_v0  ;;  %v304_v8 = vmul.f32 %v1370_v5, %v1370_v5  ;;  %v275_v10 = vsel %vm259_vm0, %v1370_v5, 0.0  ;;  %v1382_v12 = vld [vmem:[%s1351_s9 + $0x8] sm:$0xff]  ;;  %v1385_v13 = vld [vmem:[%s1351_s9 + $0x30] sm:$0xff]  ;;  %p245_p6 = scmp.lt.s32.totalorder %s1058_s10, 31 }
  0x28   : > { %v260_v3 = vsel %vm259_vm0, %v1361_v1, 0.0  ;;  %v299_v4 = vmul.f32 %v1361_v1, %v1361_v1  ;;  %273 = vadd.xlane.f32.xlu0 %v272_v2  ;;  %v300_v14 = vmul.f32 %v1382_v12, %v1382_v12  ;;  %v263_v15 = vsel %vm259_vm0, %v1382_v12, 0.0  ;;  %v1397_v19 = vld [vmem:[%s1351_s9 + $0x10] sm:$0xff]  ;;  %v1400_v20 = vld [vmem:[%s1351_s9 + $0x38] sm:$0xff] }
  0x29   : > { %261 = vadd.xlane.f32.xlu1 %v260_v3  ;;  %v319_v9 = vsel %vm259_vm0, %v303_v7, 0.0  ;;  %v322_v11 = vsel %vm259_vm0, %v304_v8, 0.0  ;;  %v278_v16 = vsel %vm259_vm0, %v1385_v13, 0.0  ;;  %v305_v18 = vmul.f32 %v1385_v13, %v1385_v13  ;;  %v1412_v26 = vld [vmem:[%s1351_s9 + $0x18] sm:$0xff]  ;;  %s2005_s10 = smov (!%p245_p6, %s1058_s10), 31 }
  0x2a   : > { %v307_v6 = vsel %vm259_vm0, %v299_v4, 0.0  ;;  %v310_v17 = vsel %vm259_vm0, %v300_v14, 0.0  ;;  %v266_v22 = vsel %vm259_vm0, %v1397_v19, 0.0  ;;  %v281_v23 = vsel %vm259_vm0, %v1400_v20, 0.0  ;;  %s1096_s13 = sshll.u32 %s2005_s10, 5 }
  0x2b   : > { %308 = vadd.xlane.f32.xlu2 %v307_v6  ;;  %v325_v21 = vsel %vm259_vm0, %v305_v18, 0.0  ;;  %v301_v24 = vmul.f32 %v1397_v19, %v1397_v19  ;;  %v306_v25 = vmul.f32 %v1400_v20, %v1400_v20  ;;  %v269_v29 = vsel %vm259_vm0, %v1412_v26, 0.0  ;;  %s1942_s16 = scalar_lea.vmem %s1978_s5, %s1096_s13 }
  0x2c   : > { %v302_v30 = vmul.f32 %v1412_v26, %v1412_v26  ;;  %1149 = vrcp.f32 %v1251_v32 }
  0x2d   : > { %v313_v27 = vsel %vm259_vm0, %v301_v24, 0.0  ;;  %v328_v28 = vsel %vm259_vm0, %v306_v25, 0.0 }
  0x2e   : > { %v316_v31 = vsel %vm259_vm0, %v302_v30, 0.0 }
  0x30   : > { %320 = vadd.xlane.f32.xlu0 %v319_v9 }
  0x31   : > { %276 = vadd.xlane.f32.xlu1 %v275_v10 }
  0x32   : > { %v1150_v33 = vpop.eup %1149 }
  0x33   : > { %323 = vadd.xlane.f32.xlu2 %v322_v11  ;;  %v285_v34 = vmul.f32 32.0, %v1150_v33  ;;  %vm289_vm1 = vweird.f32 %v1150_v33 }
  0x35   : > { %v286_v35 = vsub.f32 1.0, %v285_v34 }
  0x37   : > { %v287_v36 = vmul.f32 %v1150_v33, %v286_v35 }
  0x38   : > { %264 = vadd.xlane.f32.xlu0 %v263_v15 }
  0x39   : > { %279 = vadd.xlane.f32.xlu1 %v278_v16  ;;  %v288_v37 = vadd.f32 %v1150_v33, %v287_v36 }
  0x3b   : > { %311 = vadd.xlane.f32.xlu2 %v310_v17  ;;  %v1421_v38 = vsel %vm289_vm1, %v1150_v33, %v288_v37 }
  0x40   : > { %326 = vadd.xlane.f32.xlu0 %v325_v21 }
  0x41   : > { %267 = vadd.xlane.f32.xlu1 %v266_v22 }
  0x43   : > { %282 = vadd.xlane.f32.xlu2 %v281_v23 }
  0x48   : > { %314 = vadd.xlane.f32.xlu0 %v313_v27 }
  0x49   : > { %329 = vadd.xlane.f32.xlu1 %v328_v28 }
  0x4b   : > { %270 = vadd.xlane.f32.xlu2 %v269_v29 }
  0x50   : > { %317 = vadd.xlane.f32.xlu0 %v316_v31 }
  0x9b   : > { %v274_v39 = vpop.xlane.xlu0 %273 }
  0x9c   : > { %v262_v40 = vpop.xlane.xlu1 %261  ;;  %v1430_v45 = vmul.f32 %v1421_v38, %v274_v39 }
  0x9d   : > { %v1424_v41 = vmul.f32 %v1421_v38, %v262_v40 }
  0x9e   : > { %v309_v42 = vpop.xlane.xlu2 %308  ;;  %v343_v50 = vmul.f32 %v1430_v45, %v1430_v45 }
  0x9f   : > { %v339_v43 = vmul.f32 %v1424_v41, %v1424_v41  ;;  %v331_v44 = vmul.f32 %v309_v42, %v1421_v38  ;;  %v363_v34 = vsub.f32 %v1361_v1, %v1424_v41  ;;  %v1481_v1 = vld [vmem:[%s1974_s1] ss:$0 sm:$0xff] }
  0xa1   : > { %v347_v46 = vsub.f32 %v331_v44, %v339_v43 }
  0xa3   : > { %v355_v47 = vmax.f32 %v347_v46, 0.0  ;;  %v321_v48 = vpop.xlane.xlu0 %320 }
  0xa4   : > { %v277_v49 = vpop.xlane.xlu1 %276  ;;  %v335_v51 = vmul.f32 %v321_v48, %v1421_v38 }
  0xa5   : > { %v1436_v52 = vmul.f32 %v1421_v38, %v277_v49  ;;  %v371_v53 = vadd.f32 1e-05, %v355_v47 }
  0xa6   : > { %v324_v54 = vpop.xlane.xlu2 %323  ;;  %v351_v55 = vsub.f32 %v335_v51, %v343_v50 }
  0xa7   : > { %v344_v56 = vmul.f32 %v1436_v52, %v1436_v52  ;;  %v336_v57 = vmul.f32 %v324_v54, %v1421_v38  ;;  %1151 = vrsqrt.f32 %v371_v53  ;;  %vm385_vm3 = vweird.f32 %v371_v53 }
  0xa8   : > { %v359_v58 = vmax.f32 %v351_v55, 0.0 }
  0xa9   : > { %v352_v59 = vsub.f32 %v336_v57, %v344_v56 }
  0xaa   : > { %v375_v60 = vadd.f32 1e-05, %v359_v58 }
  0xab   : > { %v360_v61 = vmax.f32 %v352_v59, 0.0  ;;  %v265_v62 = vpop.xlane.xlu0 %264 }
  0xac   : > { %v280_v63 = vpop.xlane.xlu1 %279  ;;  %1153 = vrsqrt.f32 %v375_v60  ;;  %v1444_v3 = vmul.f32 %v1421_v38, %v265_v62  ;;  %vm425_vm6 = vweird.f32 %v375_v60  ;;  %v851_v62 = vld [vmem:[%s1976_s3 + $0x38] sm:$0xff] }
  0xad   : > { %v1441_v2 = vadd.f32 1e-05, %v360_v61  ;;  %v1152_v4 = vpop.eup %1151  ;;  %v1450_v10 = vmul.f32 %v1421_v38, %v280_v63  ;;  %v850_v61 = vld [vmem:[%s1976_s3 + $0x30] sm:$0xff]  ;;  %v848_v63 = vld [vmem:[%s1976_s3 + $0x20] sm:$0xff]  ;;  %934 = vmatpush.msra.mxu1 %v851_v62  ;;  %1101 = vmatpush.msra.mxu3 %v851_v62 }
  0xae   : > { %v312_v6 = vpop.xlane.xlu2 %311  ;;  %v380_v7 = vmul.f32 %v1152_v4, %v371_v53  ;;  %v340_v8 = vmul.f32 %v1444_v3, %v1444_v3  ;;  %vm386_vm2 = vweird.f32 %v1152_v4  ;;  %v1492_v53 = vld [vmem:[%s1975_s2] ss:$0 sm:$0xff]  ;;  %893 = vmatpush.msra.mxu0 %v850_v61  ;;  %1097 = vmatpush.msra.mxu2 %v850_v61 }
  0xaf   : > { %1155 = vrsqrt.f32 %v1441_v2  ;;  %v332_v11 = vmul.f32 %v312_v6, %v1421_v38  ;;  %v345_v24 = vmul.f32 %v1450_v10, %v1450_v10  ;;  %vm387_vm4 = vmor %vm385_vm3, %vm386_vm2  ;;  %vm435_vm9 = vweird.f32 %v1441_v2 }
  0xb0   : > { %v381_v9 = vmul.f32 %v1152_v4, %v380_v7  ;;  %894 = vmatpush.msra.mxu0 %v848_v63  ;;  %1098 = vmatpush.msra.mxu2 %v848_v63 }
  0xb1   : > { %v348_v16 = vsub.f32 %v332_v11, %v340_v8  ;;  %v849_v11 = vld [vmem:[%s1976_s3 + $0x28] sm:$0xff] }
  0xb2   : > { %v1453_v14 = vpop.eup %1153  ;;  %v382_v15 = vmul.f32 0.5, %v381_v9  ;;  %935 = vmatpush.msra.mxu1 %v849_v11  ;;  %1102 = vmatpush.msra.mxu3 %v849_v11 }
  0xb3   : > { %v420_v17 = vmul.f32 %v1453_v14, %v375_v60  ;;  %v327_v18 = vpop.xlane.xlu0 %326  ;;  %v356_v25 = vmax.f32 %v348_v16, 0.0  ;;  %vm426_vm5 = vweird.f32 %v1453_v14  ;;  %v846_v16 = vld [vmem:[%s1976_s3 + $0x10] sm:$0xff] }
  0xb4   : > { %v268_v21 = vpop.xlane.xlu1 %267  ;;  %v383_v23 = vsub.f32 1.5, %v382_v15  ;;  %v337_v27 = vmul.f32 %v327_v18, %v1421_v38  ;;  %vm1494_vm8 = vmor %vm425_vm6, %vm426_vm5  ;;  %895 = vmatpush.msra.mxu0 %v846_v16  ;;  %1099 = vmatpush.msra.mxu2 %v846_v16 }
  0xb5   : > { %v1456_v22 = vpop.eup %1155  ;;  %v421_v28 = vmul.f32 %v1453_v14, %v420_v17  ;;  %v1464_v32 = vadd.f32 1e-05, %v356_v25  ;;  %v1475_v42 = vmul.f32 %v1421_v38, %v268_v21  ;;  %v847_v17 = vld [vmem:[%s1976_s3 + $0x18] sm:$0xff]  ;;  %v367_v21 = vsub.f32 %v1358_v0, %v1430_v45  ;;  %v845_v0 = vld [vmem:[%s1976_s3 + $0x8] sm:$0xff] }
  0xb6   : > { %v430_v29 = vmul.f32 %v1456_v22, %v1441_v2  ;;  %v283_v30 = vpop.xlane.xlu2 %282  ;;  %v384_v31 = vmul.f32 %v1152_v4, %v383_v23  ;;  %v353_v33 = vsub.f32 %v337_v27, %v345_v24  ;;  %vm436_vm7 = vweird.f32 %v1456_v22  ;;  %936 = vmatpush.msra.mxu1 %v847_v17  ;;  %1103 = vmatpush.msra.mxu3 %v847_v17 }
  0xb7   : > { %v422_v35 = vmul.f32 0.5, %v421_v28  ;;  %v1471_v37 = vmul.f32 %v1421_v38, %v283_v30  ;;  %1157 = vrsqrt.f32 %v1464_v32  ;;  %v341_v55 = vmul.f32 %v1475_v42, %v1475_v42  ;;  %vm1522_vm10 = vmor %vm435_vm9, %vm436_vm7  ;;  %v844_v28 = vld [vmem:[%s1976_s3] sm:$0xff] }
  0xb8   : > { %v431_v36 = vmul.f32 %v1456_v22, %v430_v29  ;;  %v388_v39 = vsel %vm387_vm4, %v1152_v4, %v384_v31  ;;  %v361_v40 = vmax.f32 %v353_v33, 0.0  ;;  %896 = vmatpush.msra.mxu0 %v844_v28  ;;  %937 = vmatpush.msra.mxu1 %v845_v0  ;;  %vm395_vm12 = vweird.f32 %v1464_v32 }
  0xb9   : > { %v423_v43 = vsub.f32 1.5, %v422_v35  ;;  %v346_v46 = vmul.f32 %v1471_v37, %v1471_v37  ;;  %v459_v47 = vmul.f32 %v388_v39, %v363_v34  ;;  %1100 = vmatpush.msra.mxu2 %v844_v28  ;;  %1104 = vmatpush.msra.mxu3 %v845_v0 }
  0xba   : > { %v432_v44 = vmul.f32 0.5, %v431_v36  ;;  %v1483_v41 = vadd.f32 1e-05, %v361_v40 }
  0xbb   : > { %v424_v48 = vmul.f32 %v1453_v14, %v423_v43  ;;  %v315_v50 = vpop.xlane.xlu0 %314  ;;  %v471_v4 = vmul.f32 %v1481_v1, %v459_v47 }
  0xbc   : > { %v433_v49 = vsub.f32 1.5, %v432_v44  ;;  %v330_v51 = vpop.xlane.xlu1 %329  ;;  %1159 = vrsqrt.f32 %v1483_v41  ;;  %v333_v56 = vmul.f32 %v315_v50, %v1421_v38  ;;  %vm445_vm15 = vweird.f32 %v1483_v41 }
  0xbd   : > { %v338_v57 = vmul.f32 %v330_v51, %v1421_v38  ;;  %v428_v58 = vsel %vm1494_vm8, %v1453_v14, %v424_v48  ;;  %v1518_v6 = vpop.eup %1157  ;;  %v1544_v18 = vadd.f32 %v1492_v53, %v471_v4 }
  0xbe   : > { %v434_v59 = vmul.f32 %v1456_v22, %v433_v49  ;;  %v271_v60 = vpop.xlane.xlu2 %270  ;;  %v349_v7 = vsub.f32 %v333_v56, %v341_v55  ;;  %v390_v15 = vmul.f32 %v1518_v6, %v1464_v32  ;;  %v463_v30 = vmul.f32 %v428_v58, %v367_v21 }
  0xbf   : > { %v354_v8 = vsub.f32 %v338_v57, %v346_v46  ;;  %v1527_v9 = vmul.f32 %v1421_v38, %v271_v60  ;;  %v1560_v45 = vmul.f32 0.70710677, %v1544_v18  ;;  %vm396_vm11 = vweird.f32 %v1518_v6 }
  0xc0   : > { %v438_v14 = vsel %vm1522_vm10, %v1456_v22, %v434_v59  ;;  %v368_v22 = vsub.f32 %v1370_v5, %v1436_v52  ;;  %v357_v23 = vmax.f32 %v349_v7, 0.0  ;;  %v391_v25 = vmul.f32 %v1518_v6, %v390_v15  ;;  %vm1610_vm14 = vmor %vm395_vm12, %vm396_vm11 }
  0xc1   : > { %v362_v24 = vmax.f32 %v354_v8, 0.0  ;;  %v342_v27 = vmul.f32 %v1527_v9, %v1527_v9  ;;  %v507_v36 = vmul.f32 %v1560_v45, %v1560_v45  ;;  %v475_v47 = vmul.f32 %v1481_v1, %v463_v30 }
  0xc2   : > { %v1562_v5 = vpop.eup %1159  ;;  %v1564_v52 = vadd.f32 1e-05, %v357_v23  ;;  %v464_v31 = vmul.f32 %v438_v14, %v368_v22  ;;  %v392_v33 = vmul.f32 0.5, %v391_v25  ;;  %v364_v22 = vsub.f32 %v1382_v12, %v1444_v3 }
  0xc3   : > { %v1566_v29 = vadd.f32 1e-05, %v362_v24  ;;  %v440_v34 = vmul.f32 %v1562_v5, %v1483_v41  ;;  %v318_v35 = vpop.xlane.xlu0 %317  ;;  %v1576_v43 = vmin.f32 %v507_v36, 16.0  ;;  %v1583_v54 = vadd.f32 %v1492_v53, %v475_v47 }
  0xc4   : > { %1161 = vrsqrt.f32 %v1564_v52  ;;  %v334_v39 = vmul.f32 %v318_v35, %v1421_v38  ;;  %v393_v44 = vsub.f32 1.5, %v392_v33  ;;  %v476_v48 = vmul.f32 %v1481_v1, %v464_v31 }
  0xc5   : > { %v441_v40 = vmul.f32 %v1562_v5, %v440_v34  ;;  %1163 = vrsqrt.f32 %v1566_v29  ;;  %v509_v50 = vmul.f32 2.1237322e-06, %v1576_v43  ;;  %v520_v38 = vmul.f32 3.8918573e-05, %v1576_v43 }
  0xc6   : > { %v350_v46 = vsub.f32 %v334_v39, %v342_v27  ;;  %v394_v59 = vmul.f32 %v1518_v6, %v393_v44  ;;  %v1592_v61 = vmul.f32 0.70710677, %v1583_v54  ;;  %v1595_v62 = vadd.f32 %v1492_v53, %v476_v48 }
  0xc7   : > { %v442_v49 = vmul.f32 0.5, %v441_v40  ;;  %v510_v56 = vadd.f32 0.00028619796, %v509_v50  ;;  %v521_v57 = vadd.f32 0.001143296, %v520_v38  ;;  %vm446_vm13 = vweird.f32 %v1562_v5 }
  0xc8   : > { %v358_v51 = vmax.f32 %v350_v46, 0.0  ;;  %v398_v16 = vsel %vm1610_vm14, %v1518_v6, %v394_v59  ;;  %v667_v17 = vmul.f32 %v1592_v61, %v1592_v61  ;;  %v1623_v21 = vmul.f32 0.70710677, %v1595_v62  ;;  %vm1629_vm1 = vmor %vm445_vm15, %vm446_vm13 }
  0xc9   : > { %v443_v55 = vsub.f32 1.5, %v442_v49  ;;  %v511_v2 = vmul.f32 %v510_v56, %v1576_v43  ;;  %v522_v15 = vmul.f32 %v521_v57, %v1576_v43  ;;  %v369_v23 = vsub.f32 %v1385_v13, %v1450_v10 }
  0xca   : > { %v1586_v58 = vpop.eup %1161  ;;  %v1589_v60 = vadd.f32 1e-05, %v358_v51  ;;  %v1638_v28 = vmin.f32 %v667_v17, 16.0  ;;  %v707_v12 = vmul.f32 %v1623_v21, %v1623_v21  ;;  %v460_v0 = vmul.f32 %v398_v16, %v364_v22 }
  0xcb   : > { %v1597_v63 = vpop.eup %1163  ;;  %v400_v4 = vmul.f32 %v1586_v58, %v1564_v52  ;;  %v444_v7 = vmul.f32 %v1562_v5, %v443_v55  ;;  %v512_v14 = vadd.f32 0.0036580483, %v511_v2  ;;  %v523_v25 = vadd.f32 0.014752088, %v522_v15 }
  0xcc   : > { %v450_v8 = vmul.f32 %v1597_v63, %v1566_v29  ;;  %1165 = vrsqrt.f32 %v1589_v60  ;;  %v365_v31 = vsub.f32 %v1397_v19, %v1475_v42  ;;  %v669_v33 = vmul.f32 2.1237322e-06, %v1638_v28 }
  0xcd   : > { %v401_v32 = vmul.f32 %v1586_v58, %v400_v4  ;;  %v513_v6 = vmul.f32 %v512_v14, %v1576_v43  ;;  %v448_v41 = vsel %vm1629_vm1, %v1562_v5, %v444_v7  ;;  %v524_v10 = vmul.f32 %v523_v25, %v1576_v43 }
  0xce   : > { %v451_v27 = vmul.f32 %v1597_v63, %v450_v8  ;;  %v680_v5 = vmul.f32 3.8918573e-05, %v1638_v28  ;;  %v1649_v34 = vmin.f32 %v707_v12, 16.0  ;;  %v370_v35 = vsub.f32 %v1400_v20, %v1471_v37 }
  0xcf   : > { %v402_v3 = vmul.f32 0.5, %v401_v32  ;;  %v514_v13 = vadd.f32 0.05243302, %v513_v6  ;;  %v1656_v39 = vmul.f32 0.5, %v1544_v18  ;;  %v525_v44 = vadd.f32 0.112945676, %v524_v10 }
  0xd0   : > { %v670_v46 = vadd.f32 0.00028619796, %v669_v33  ;;  %v681_v47 = vadd.f32 0.001143296, %v680_v5  ;;  %v465_v48 = vmul.f32 %v448_v41, %v369_v23  ;;  %v452_v50 = vmul.f32 0.5, %v451_v27 }
  0xd1   : > { %v515_v40 = vmul.f32 %v514_v13, %v1576_v43  ;;  %v403_v49 = vsub.f32 1.5, %v402_v3  ;;  %v709_v38 = vmul.f32 2.1237322e-06, %v1649_v34  ;;  %v472_v51 = vmul.f32 %v1481_v1, %v460_v0 }
  0xd2   : > { %v1643_v30 = vpop.eup %1165  ;;  %v526_v56 = vmul.f32 %v525_v44, %v1576_v43  ;;  %v671_v57 = vmul.f32 %v670_v46, %v1638_v28  ;;  %v682_v18 = vmul.f32 %v681_v47, %v1638_v28  ;;  %vm405_vm2 = vweird.f32 %v1564_v52 }
  0xd3   : > { %v410_v36 = vmul.f32 %v1643_v30, %v1589_v60  ;;  %v516_v59 = vadd.f32 0.18741608, %v515_v40  ;;  %v710_v4 = vadd.f32 0.00028619796, %v709_v38  ;;  %v720_v2 = vmul.f32 3.8918573e-05, %v1649_v34 }
  0xd4   : > { %vm455_vm3 = vweird.f32 %v1566_v29  ;;  %v527_v7 = vadd.f32 0.4994258, %v526_v56  ;;  %v672_v8 = vadd.f32 0.0036580483, %v671_v57  ;;  %v683_v11 = vadd.f32 0.014752088, %v682_v18 }
  0xd5   : > { %v411_v55 = vmul.f32 %v1643_v30, %v410_v36  ;;  %v477_v32 = vmul.f32 %v1481_v1, %v465_v48  ;;  %v453_v14 = vsub.f32 1.5, %v452_v50  ;;  %v711_v15 = vmul.f32 %v710_v4, %v1649_v34 }
  0xd6   : > { %v721_v16 = vadd.f32 0.001143296, %v720_v2  ;;  %v1671_v17 = vadd.f32 %v1492_v53, %v472_v51  ;;  %v528_v23 = vmul.f32 %v527_v7, %v1576_v43  ;;  %v673_v24 = vmul.f32 %v672_v8, %v1638_v28 }
  0xd7   : > { %v412_v22 = vmul.f32 0.5, %v411_v55  ;;  %v684_v6 = vmul.f32 %v683_v11, %v1638_v28  ;;  %vm406_vm4 = vweird.f32 %v1586_v58  ;;  %v517_v25 = vmul.f32 %v516_v59, %v1576_v43 }
  0xd8   : > { %v712_v41 = vadd.f32 0.0036580483, %v711_v15  ;;  %v722_v27 = vmul.f32 %v721_v16, %v1649_v34  ;;  %vm456_vm5 = vweird.f32 %v1597_v63  ;;  %v1680_v12 = vadd.f32 1.0, %v528_v23  ;;  %vm1701_vm6 = vmor %vm405_vm2, %vm406_vm4 }
  0xd9   : > { %v674_v3 = vadd.f32 0.05243302, %v673_v24  ;;  %v685_v13 = vadd.f32 0.112945676, %v684_v6  ;;  %v404_v10 = vmul.f32 %v1586_v58, %v403_v49  ;;  %v1685_v5 = vmul.f32 0.70710677, %v1671_v17  ;;  %vm1718_vm8 = vmor %vm455_vm3, %vm456_vm5 }
  0xda   : > { %v713_v0 = vmul.f32 %v712_v41, %v1649_v34  ;;  %v723_v33 = vadd.f32 0.014752088, %v722_v27  ;;  %v1688_v36 = vmul.f32 %v1597_v63, %v453_v14  ;;  %v413_v43 = vsub.f32 1.5, %v412_v22 }
  0xdb   : > { %1167 = vrcp.f32 %v1680_v12  ;;  %v1692_v40 = vadd.f32 %v1492_v53, %v477_v32  ;;  %v518_v44 = vadd.f32 1.1283791, %v517_v25  ;;  %v675_v46 = vmul.f32 %v674_v3, %v1638_v28 }
  0xdc   : > { %v686_v47 = vmul.f32 %v685_v13, %v1638_v28  ;;  %v724_v48 = vmul.f32 %v723_v33, %v1649_v34  ;;  %vm415_vm7 = vweird.f32 %v1589_v60  ;;  %v1707_v50 = vmul.f32 0.5, %v1583_v54 }
  0xdd   : > { %v714_v38 = vadd.f32 0.05243302, %v713_v0  ;;  %v547_v51 = vmul.f32 %v1685_v5, %v1685_v5  ;;  %v408_v55 = vsel %vm1701_vm6, %v1586_v58, %v404_v10  ;;  %vm416_vm9 = vweird.f32 %v1643_v30 }
  0xde   : > { %v687_v54 = vadd.f32 0.4994258, %v686_v47  ;;  %v725_v56 = vadd.f32 0.112945676, %v724_v48  ;;  %v458_v57 = vsel %vm1718_vm8, %v1597_v63, %v1688_v36  ;;  %v676_v18 = vadd.f32 0.18741608, %v675_v46  ;;  %vm1752_vm10 = vmor %vm415_vm7, %vm416_vm9 }
  0xdf   : > { %v1727_v59 = vmin.f32 %v547_v51, 16.0  ;;  %v1730_v58 = vmul.f32 0.70710677, %v1692_v40  ;;  %v1733_v29 = vmul.f32 %v1643_v30, %v413_v43  ;;  %v519_v4 = vmul.f32 %v518_v44, %v1560_v45 }
  0xe0   : > { %v688_v2 = vmul.f32 %v687_v54, %v1638_v28  ;;  %v726_v7 = vmul.f32 %v725_v56, %v1649_v34  ;;  %v539_v11 = vand.u32 2147483647, %v1680_v12  ;;  %v715_v63 = vmul.f32 %v714_v38, %v1649_v34 }
  0xe1   : > { %v1168_v8 = vpop.eup %1167  ;;  %v549_v32 = vmul.f32 2.1237322e-06, %v1727_v59  ;;  %v560_v14 = vmul.f32 3.8918573e-05, %v1727_v59  ;;  %v541_v16 = vand.u32 2147483648, %v1680_v12  ;;  %v747_v45 = vmul.f32 %v1730_v58, %v1730_v58 }
  0xe2   : > { %v531_v15 = vmul.f32 %v1168_v8, %v1680_v12  ;;  %v1744_v22 = vadd.f32 1.0, %v688_v2  ;;  %v677_v24 = vmul.f32 %v676_v18, %v1638_v28  ;;  %v727_v6 = vadd.f32 0.4994258, %v726_v7 }
  0xe3   : > { %v550_v25 = vadd.f32 0.00028619796, %v549_v32  ;;  %v561_v41 = vadd.f32 0.001143296, %v560_v14  ;;  %v418_v27 = vsel %vm1752_vm10, %v1643_v30, %v1733_v29  ;;  %vm535_vm11 = vweird.f32 %v1680_v12 }
  0xe4   : > { %v532_v3 = vsub.f32 1.0, %v531_v15  ;;  %1169 = vrcp.f32 %v1744_v22  ;;  %vm536_vm12 = vweird.f32 %v1168_v8  ;;  %v716_v60 = vadd.f32 0.18741608, %v715_v63 }
  0xe5   : > { %v728_v13 = vmul.f32 %v727_v6, %v1649_v34  ;;  %v461_v28 = vmul.f32 %v408_v55, %v365_v31  ;;  %v551_v0 = vmul.f32 %v550_v25, %v1727_v59  ;;  %v562_v33 = vmul.f32 %v561_v41, %v1727_v59  ;;  %vm537_vm14 = vmor %vm535_vm11, %vm536_vm12 }
  0xe6   : > { %v533_v10 = vmul.f32 %v1168_v8, %v532_v3  ;;  %v1769_v36 = vmin.f32 %v747_v45, 16.0  ;;  %vm1771_vm13 = vcmp.eq.f32.partialorder %v539_v11, 8.507059e+37  ;;  %v542_v44 = vor.u32 1.1754944e-38, %v541_v16 }
  0xe7   : > { %v678_v46 = vadd.f32 1.1283791, %v677_v24  ;;  %v1775_v47 = vadd.f32 1.0, %v728_v13  ;;  %v552_v49 = vadd.f32 0.0036580483, %v551_v0  ;;  %v717_v31 = vmul.f32 %v716_v60, %v1649_v34 }
  0xe8   : > { %v534_v48 = vadd.f32 %v1168_v8, %v533_v10  ;;  %v563_v38 = vadd.f32 0.014752088, %v562_v33  ;;  %v749_v19 = vmul.f32 2.1237322e-06, %v1769_v36  ;;  %v699_v42 = vand.u32 2147483647, %v1744_v22 }
  0xe9   : > { %1171 = vrcp.f32 %v1775_v47  ;;  %v466_v51 = vmul.f32 %v458_v57, %v370_v35  ;;  %v473_v18 = vmul.f32 %v1481_v1, %v461_v28  ;;  %v679_v2 = vmul.f32 %v678_v46, %v1592_v61 }
  0xea   : > { %v1170_v55 = vpop.eup %1169  ;;  %v538_v52 = vsel %vm537_vm14, %v1168_v8, %v534_v48  ;;  %v564_v54 = vmul.f32 %v563_v38, %v1727_v59  ;;  %v750_v56 = vadd.f32 0.00028619796, %v749_v19  ;;  %v553_v7 = vmul.f32 %v552_v49, %v1727_v59 }
  0xeb   : > { %v543_v12 = vsel %vm1771_vm13, %v542_v44, %v538_v52  ;;  %v691_v34 = vmul.f32 %v1170_v55, %v1744_v22  ;;  %vm695_vm15 = vweird.f32 %v1744_v22  ;;  %v701_v20 = vand.u32 2147483648, %v1744_v22 }
  0xec   : > { %v544_v11 = vmul.f32 %v543_v12, %v519_v4  ;;  %v565_v37 = vadd.f32 0.112945676, %v564_v54  ;;  %vm1796_vm1 = vcmp.eq.f32.partialorder %v699_v42, 8.507059e+37  ;;  %v718_v8 = vadd.f32 1.1283791, %v717_v31 }
  0xed   : > { %v692_v35 = vsub.f32 1.0, %v691_v34  ;;  %v760_v63 = vmul.f32 3.8918573e-05, %v1769_v36  ;;  %v751_v14 = vmul.f32 %v750_v56, %v1769_v36  ;;  %v1804_v4 = vadd.f32 %v1492_v53, %v473_v18 }
  0xee   : > { %v1061_v32 = vclamps-f32 %v544_v11, 1.0  ;;  %v566_v61 = vmul.f32 %v565_v37, %v1727_v59  ;;  %vm696_vm2 = vweird.f32 %v1170_v55  ;;  %v554_v45 = vadd.f32 0.05243302, %v553_v7 }
  0xef   : > { %v1172_v15 = vpop.eup %1171  ;;  %v693_v16 = vmul.f32 %v1170_v55, %v692_v35  ;;  %v761_v24 = vadd.f32 0.001143296, %v760_v63  ;;  %v702_v25 = vor.u32 1.1754944e-38, %v701_v20  ;;  %v739_v3 = vand.u32 2147483647, %v1775_v47  ;;  %vm697_vm3 = vmor %vm695_vm15, %vm696_vm2 }
  0xf0   : > { %v827_v6 = vadd.f32 1.0, %v1061_v32  ;;  %v731_v41 = vmul.f32 %v1172_v15, %v1775_v47  ;;  %v741_v13 = vand.u32 2147483648, %v1775_v47  ;;  %v567_v28 = vadd.f32 0.4994258, %v566_v61 }
  0xf1   : > { %v694_v60 = vadd.f32 %v1170_v55, %v693_v16  ;;  %v762_v10 = vmul.f32 %v761_v24, %v1769_v36  ;;  %v752_v43 = vadd.f32 0.0036580483, %v751_v14  ;;  %v1814_v44 = vmul.f32 0.70710677, %v1804_v4 }
  0xf2   : > { %v835_v0 = vmul.f32 %v827_v6, %v1656_v39  ;;  %v732_v33 = vsub.f32 1.0, %v731_v41  ;;  %v555_v48 = vmul.f32 %v554_v45, %v1727_v59  ;;  %v568_v49 = vmul.f32 %v567_v28, %v1727_v59 }
  0xf3   : > { %v698_v46 = vsel %vm697_vm3, %v1170_v55, %v694_v60  ;;  %v763_v38 = vadd.f32 0.014752088, %v762_v10  ;;  %vm736_vm4 = vweird.f32 %v1172_v15  ;;  %v587_v19 = vmul.f32 %v1814_v44, %v1814_v44 }
  0xf4   : > { %1069 = vmatmul.msk.f32.vlgmr.msra.gmra.mxu0 %vm259_vm0, %v835_v0  ;;  %1077 = vmatmul.msk.f32.vlgmr.msra.gmra.mxu1 %vm259_vm0, %v835_v0  ;;  %v703_v39 = vsel %vm1796_vm1, %v702_v25, %v698_v46  ;;  %v733_v22 = vmul.f32 %v1172_v15, %v732_v33  ;;  %v1824_v31 = vadd.f32 1.0, %v568_v49  ;;  %v478_v52 = vmul.f32 %v1481_v1, %v466_v51 }
  0xf5   : > { %v704_v42 = vmul.f32 %v703_v39, %v679_v2  ;;  %v764_v55 = vmul.f32 %v763_v38, %v1769_v36  ;;  %vm735_vm5 = vweird.f32 %v1775_v47  ;;  %v753_v56 = vmul.f32 %v752_v43, %v1769_v36 }
  0xf6   : > { %v734_v54 = vadd.f32 %v1172_v15, %v733_v22  ;;  %v1830_v18 = vmin.f32 %v587_v19, 16.0  ;;  %v719_v34 = vmul.f32 %v718_v8, %v1623_v21  ;;  %vm737_vm6 = vmor %vm735_vm5, %vm736_vm4  ;;  %v742_v7 = vor.u32 1.1754944e-38, %v741_v13 }
  0xf7   : > { %v1065_v12 = vclamps-f32 %v704_v42, 1.0  ;;  %1173 = vrcp.f32 %v1824_v31  ;;  %vm740_vm7 = vcmp.eq.f32.partialorder %v739_v3, 8.507059e+37  ;;  %v556_v11 = vadd.f32 0.18741608, %v555_v48 }
  0xf8   : > { %v738_v2 = vsel %vm737_vm6, %v1172_v15, %v734_v54  ;;  %v765_v20 = vadd.f32 0.112945676, %v764_v55  ;;  %v589_v35 = vmul.f32 2.1237322e-06, %v1830_v18  ;;  %v1836_v47 = vadd.f32 %v1492_v53, %v478_v52 }
  0xf9   : > { %v831_v37 = vadd.f32 1.0, %v1065_v12  ;;  %v743_v51 = vsel %vm740_vm7, %v742_v7, %v738_v2  ;;  %v366_v57 = vsub.f32 %v1412_v26, %v1527_v9  ;;  %v754_v21 = vadd.f32 0.05243302, %v753_v56 }
  0xfa   : > { %v744_v63 = vmul.f32 %v743_v51, %v719_v34  ;;  %v766_v8 = vmul.f32 %v765_v20, %v1769_v36  ;;  %v590_v61 = vadd.f32 0.00028619796, %v589_v35  ;;  %v600_v14 = vmul.f32 3.8918573e-05, %v1830_v18 }
  0xfb   : > { %v839_v32 = vmul.f32 %v831_v37, %v1707_v50  ;;  %v557_v16 = vmul.f32 %v556_v11, %v1727_v59  ;;  %v462_v24 = vmul.f32 %v418_v27, %v366_v57  ;;  %v1852_v50 = vmul.f32 0.70710677, %v1836_v47 }
  0xfc   : > { %v1066_v15 = vclamps-f32 %v744_v63, 1.0  ;;  %v767_v45 = vadd.f32 0.4994258, %v766_v8  ;;  %v601_v9 = vadd.f32 0.001143296, %v600_v14  ;;  %v496_v6 = vmul.f32 0.5, %v1595_v62 }
  0xfd   : > { %v1174_v26 = vpop.eup %1173  ;;  %1073 = vmatmul.msk.f32.vlgmr.msra.gmra.mxu2 %vm259_vm0, %v839_v32  ;;  %1081 = vmatmul.msk.f32.vlgmr.msra.gmra.mxu3 %vm259_vm0, %v839_v32  ;;  %v755_v25 = vmul.f32 %v754_v21, %v1769_v36  ;;  %v591_v23 = vmul.f32 %v590_v61, %v1830_v18  ;;  %v787_v27 = vmul.f32 %v1852_v50, %v1852_v50  ;;  %v558_v3 = vadd.f32 1.1283791, %v557_v16 }
  0xfe   : > { %v571_v59 = vmul.f32 %v1174_v26, %v1824_v31  ;;  %v832_v41 = vadd.f32 1.0, %v1066_v15  ;;  %v768_v30 = vmul.f32 %v767_v45, %v1769_v36  ;;  %v602_v29 = vmul.f32 %v601_v9, %v1830_v18 }
  0xff   : > { %v579_v13 = vand.u32 2147483647, %v1824_v31  ;;  %v474_v62 = vmul.f32 %v1481_v1, %v462_v24  ;;  %v581_v28 = vand.u32 2147483648, %v1824_v31  ;;  %v1867_v33 = vmin.f32 %v787_v27, 16.0 }
 0x100   : > { %v572_v60 = vsub.f32 1.0, %v571_v59  ;;  %v1865_v10 = vadd.f32 1.0, %v768_v30  ;;  %v603_v0 = vadd.f32 0.014752088, %v602_v29  ;;  %vm576_vm8 = vweird.f32 %v1174_v26 }
 0x101   : > { %v756_v46 = vadd.f32 0.18741608, %v755_v25  ;;  %v840_v48 = vmul.f32 %v832_v41, %v496_v6  ;;  %v592_v49 = vadd.f32 0.0036580483, %v591_v23  ;;  %v1871_v38 = vadd.f32 %v1492_v53, %v474_v62 }
 0x102   : > { %v573_v43 = vmul.f32 %v1174_v26, %v572_v60  ;;  %1175 = vrcp.f32 %v1865_v10  ;;  %vm575_vm9 = vweird.f32 %v1824_v31  ;;  %v604_v1 = vmul.f32 %v603_v0, %v1830_v18 }
 0x103   : > { %v789_v22 = vmul.f32 2.1237322e-06, %v1867_v33  ;;  %v559_v19 = vmul.f32 %v558_v3, %v1685_v5  ;;  %vm577_vm10 = vmor %vm575_vm9, %vm576_vm8  ;;  %vm580_vm11 = vcmp.eq.f32.partialorder %v579_v13, 8.507059e+37  ;;  %v582_v42 = vor.u32 1.1754944e-38, %v581_v28 }
 0x104   : > { %v574_v39 = vadd.f32 %v1174_v26, %v573_v43  ;;  %v800_v55 = vmul.f32 3.8918573e-05, %v1867_v33  ;;  %v757_v52 = vmul.f32 %v756_v46, %v1769_v36  ;;  %v605_v54 = vadd.f32 0.112945676, %v604_v1 }
 0x105   : > { %1074 = vmatmul.msk.f32.gmra.mxu2 %vm259_vm0, %v840_v48  ;;  %1082 = vmatmul.msk.f32.gmra.mxu3 %vm259_vm0, %v840_v48  ;;  %v790_v31 = vadd.f32 0.00028619796, %v789_v22  ;;  %v593_v12 = vmul.f32 %v592_v49, %v1830_v18  ;;  %v1883_v7 = vmul.f32 0.70710677, %v1871_v38  ;;  %v492_v51 = vmul.f32 0.5, %v1671_v17 }
 0x106   : > { %v578_v53 = vsel %vm577_vm10, %v1174_v26, %v574_v39  ;;  %v801_v34 = vadd.f32 0.001143296, %v800_v55  ;;  %v606_v5 = vmul.f32 %v605_v54, %v1830_v18  ;;  %v758_v57 = vadd.f32 1.1283791, %v757_v52 }
 0x107   : > { %v583_v56 = vsel %vm580_vm11, %v582_v42, %v578_v53  ;;  %v791_v20 = vmul.f32 %v790_v31, %v1867_v33  ;;  %v627_v36 = vmul.f32 %v1883_v7, %v1883_v7  ;;  %v594_v21 = vadd.f32 0.05243302, %v593_v12 }
 0x108   : > { %v584_v2 = vmul.f32 %v583_v56, %v559_v19  ;;  %v1176_v11 = vpop.eup %1175  ;;  %v802_v37 = vmul.f32 %v801_v34, %v1867_v33  ;;  %v607_v8 = vadd.f32 0.4994258, %v606_v5  ;;  %v779_v15 = vand.u32 2147483647, %v1865_v10 }
 0x109   : > { %v771_v63 = vmul.f32 %v1176_v11, %v1865_v10  ;;  %v1893_v16 = vmin.f32 %v627_v36, 16.0  ;;  %v781_v45 = vand.u32 2147483648, %v1865_v10  ;;  %v792_v26 = vadd.f32 0.0036580483, %v791_v20 }
 0x10a   : > { %v1062_v35 = vclamps-f32 %v584_v2, 1.0  ;;  %v803_v32 = vadd.f32 0.014752088, %v802_v37  ;;  %v608_v24 = vmul.f32 %v607_v8, %v1830_v18  ;;  %vm776_vm12 = vweird.f32 %v1176_v11 }
 0x10b   : > { %v772_v14 = vsub.f32 1.0, %v771_v63  ;;  %v629_v59 = vmul.f32 2.1237322e-06, %v1893_v16  ;;  %v595_v25 = vmul.f32 %v594_v21, %v1830_v18  ;;  %vm775_vm13 = vweird.f32 %v1865_v10 }
 0x10c   : > { %v828_v61 = vadd.f32 1.0, %v1062_v35  ;;  %v804_v17 = vmul.f32 %v803_v32, %v1867_v33  ;;  %v609_v23 = vadd.f32 1.0, %v608_v24  ;;  %v640_v29 = vmul.f32 3.8918573e-05, %v1893_v16  ;;  %vm777_vm14 = vmor %vm775_vm13, %vm776_vm12 }
 0x10d   : > { %v773_v6 = vmul.f32 %v1176_v11, %v772_v14  ;;  %v782_v27 = vor.u32 1.1754944e-38, %v781_v45  ;;  %v793_v3 = vmul.f32 %v792_v26, %v1867_v33  ;;  %v630_v60 = vadd.f32 0.00028619796, %v629_v59 }
 0x10e   : > { %v836_v9 = vmul.f32 %v828_v61, %v492_v51  ;;  %v805_v41 = vadd.f32 0.112945676, %v804_v17  ;;  %1177 = vrcp.f32 %v609_v23  ;;  %v759_v13 = vmul.f32 %v758_v57, %v1730_v58 }
 0x10f   : > { %v774_v30 = vadd.f32 %v1176_v11, %v773_v6  ;;  %vm780_vm15 = vcmp.eq.f32.partialorder %v779_v15, 8.507059e+37  ;;  %v596_v43 = vadd.f32 0.18741608, %v595_v25  ;;  %v641_v46 = vadd.f32 0.001143296, %v640_v29 }
 0x110   : > { %1070 = vmatmul.msk.f32.gmra.mxu0 %vm259_vm0, %v836_v9  ;;  %1078 = vmatmul.msk.f32.gmra.mxu1 %vm259_vm0, %v836_v9  ;;  %v806_v28 = vmul.f32 %v805_v41, %v1867_v33  ;;  %v794_v10 = vadd.f32 0.05243302, %v793_v3  ;;  %v631_v39 = vmul.f32 %v630_v60, %v1893_v16  ;;  %v497_v53 = vmul.f32 0.5, %v1692_v40 }
 0x111   : > { %v778_v62 = vsel %vm777_vm14, %v1176_v11, %v774_v30  ;;  %v642_v1 = vmul.f32 %v641_v46, %v1893_v16  ;;  %v597_v58 = vmul.f32 %v596_v43, %v1830_v18  ;;  %v621_v20 = vand.u32 2147483648, %v609_v23 }
 0x112   : > { %v783_v0 = vsel %vm780_vm15, %v782_v27, %v778_v62  ;;  %v807_v49 = vadd.f32 0.4994258, %v806_v28  ;;  %v795_v31 = vmul.f32 %v794_v10, %v1867_v33  ;;  %v632_v12 = vadd.f32 0.0036580483, %v631_v39 }
 0x113   : > { %v784_v48 = vmul.f32 %v783_v0, %v759_v13  ;;  %v643_v55 = vadd.f32 0.014752088, %v642_v1  ;;  %v598_v11 = vadd.f32 1.1283791, %v597_v58  ;;  %v619_v40 = vand.u32 2147483647, %v609_v23 }
 0x114   : > { %v808_v19 = vmul.f32 %v807_v49, %v1867_v33  ;;  %v1178_v42 = vpop.eup %1177  ;;  %v796_v36 = vadd.f32 0.18741608, %v795_v31  ;;  %v633_v51 = vmul.f32 %v632_v12, %v1893_v16  ;;  %vm615_vm2 = vweird.f32 %v609_v23 }
 0x115   : > { %v1067_v22 = vclamps-f32 %v784_v48, 1.0  ;;  %v611_v54 = vmul.f32 %v1178_v42, %v609_v23  ;;  %v644_v34 = vmul.f32 %v643_v55, %v1893_v16  ;;  %vm616_vm1 = vweird.f32 %v1178_v42 }
 0x116   : > { %v809_v56 = vadd.f32 1.0, %v808_v19  ;;  %vm617_vm3 = vmor %vm615_vm2, %vm616_vm1  ;;  %v622_v63 = vor.u32 1.1754944e-38, %v621_v20  ;;  %v599_v21 = vmul.f32 %v598_v11, %v1814_v44  ;;  %vm620_vm4 = vcmp.eq.f32.partialorder %v619_v40, 8.507059e+37 }
 0x117   : > { %v833_v52 = vadd.f32 1.0, %v1067_v22  ;;  %v612_v5 = vsub.f32 1.0, %v611_v54  ;;  %v645_v37 = vadd.f32 0.112945676, %v644_v34  ;;  %v797_v15 = vmul.f32 %v796_v36, %v1867_v33 }
 0x118   : > { %1179 = vrcp.f32 %v809_v56  ;;  %v634_v45 = vadd.f32 0.05243302, %v633_v51  ;;  %v493_v9 = vmul.f32 0.5, %v1804_v4  ;;  %v821_v23 = vand.u32 2147483648, %v809_v56 }
 0x119   : > { %v841_v2 = vmul.f32 %v833_v52, %v497_v53  ;;  %v613_v18 = vmul.f32 %v1178_v42, %v612_v5  ;;  %v646_v57 = vmul.f32 %v645_v37, %v1893_v16  ;;  %v798_v25 = vadd.f32 1.1283791, %v797_v15 }
 0x11a   : > { %v635_v44 = vmul.f32 %v634_v45, %v1893_v16  ;;  %v819_v27 = vand.u32 2147483647, %v809_v56  ;;  %vm815_vm6 = vweird.f32 %v809_v56  ;;  %v822_v60 = vor.u32 1.1754944e-38, %v821_v23 }
 0x11b   : > { %1075 = vmatmul.msk.f32.gmra.mxu2 %vm259_vm0, %v841_v2  ;;  %1083 = vmatmul.msk.f32.gmra.mxu3 %vm259_vm0, %v841_v2  ;;  %v614_v35 = vadd.f32 %v1178_v42, %v613_v18  ;;  %v647_v32 = vadd.f32 0.4994258, %v646_v57  ;;  %v799_v4 = vmul.f32 %v798_v25, %v1852_v50  ;;  %v498_v10 = vmul.f32 0.5, %v1836_v47 }
 0x11c   : > { %v636_v13 = vadd.f32 0.18741608, %v635_v44  ;;  %vm820_vm8 = vcmp.eq.f32.partialorder %v819_v27, 8.507059e+37 }
 0x11d   : > { %v618_v8 = vsel %vm617_vm3, %v1178_v42, %v614_v35  ;;  %v648_v17 = vmul.f32 %v647_v32, %v1893_v16 }
 0x11e   : > { %v1180_v61 = vpop.eup %1179  ;;  %v623_v14 = vsel %vm620_vm4, %v622_v63, %v618_v8  ;;  %v637_v46 = vmul.f32 %v636_v13, %v1893_v16 }
 0x11f   : > { %v624_v24 = vmul.f32 %v623_v14, %v599_v21  ;;  %v811_v26 = vmul.f32 %v1180_v61, %v809_v56  ;;  %v649_v41 = vadd.f32 1.0, %v648_v17  ;;  %vm816_vm5 = vweird.f32 %v1180_v61 }
 0x120   : > { %vm817_vm7 = vmor %vm815_vm6, %vm816_vm5  ;;  %v638_v22 = vadd.f32 1.1283791, %v637_v46  ;;  %v494_v56 = vmul.f32 0.5, %v1871_v38 }
 0x121   : > { %v1063_v6 = vclamps-f32 %v624_v24, 1.0  ;;  %v812_v59 = vsub.f32 1.0, %v811_v26  ;;  %1181 = vrcp.f32 %v649_v41  ;;  %v661_v19 = vand.u32 2147483648, %v649_v41 }
 0x122   : > { %v659_v50 = vand.u32 2147483647, %v649_v41  ;;  %vm655_vm10 = vweird.f32 %v649_v41  ;;  %v639_v53 = vmul.f32 %v638_v22, %v1883_v7  ;;  %v843_v7 = vld [vmem:[%s1977_s4] sm:$0x3] }
 0x123   : > { %v829_v30 = vadd.f32 1.0, %v1063_v6  ;;  %v813_v29 = vmul.f32 %v1180_v61, %v812_v59  ;;  %v662_v16 = vor.u32 1.1754944e-38, %v661_v19  ;;  %v853_v2 = vperm.slane %v843_v7, 0 }
 0x124   : > { %vm660_vm12 = vcmp.eq.f32.partialorder %v659_v50, 8.507059e+37  ;;  %v854_v5 = vperm.slane %v843_v7, 1 }
 0x125   : > { %v837_v33 = vmul.f32 %v829_v30, %v493_v9  ;;  %v814_v3 = vadd.f32 %v1180_v61, %v813_v29 }
 0x127   : > { %1071 = vmatmul.msk.f32.gmra.mxu0 %vm259_vm0, %v837_v33  ;;  %v818_v62 = vsel %vm817_vm7, %v1180_v61, %v814_v3  ;;  %1079 = vmatmul.msk.f32.gmra.mxu1 %vm259_vm0, %v837_v33  ;;  %v1182_v43 = vpop.eup %1181 }
 0x128   : > { %v823_v28 = vsel %vm820_vm8, %v822_v60, %v818_v62  ;;  %v651_v49 = vmul.f32 %v1182_v43, %v649_v41  ;;  %vm656_vm9 = vweird.f32 %v1182_v43 }
 0x129   : > { %v824_v0 = vmul.f32 %v823_v28, %v799_v4  ;;  %vm657_vm11 = vmor %vm655_vm10, %vm656_vm9 }
 0x12a   : > { %v652_v1 = vsub.f32 1.0, %v651_v49 }
 0x12b   : > { %v1068_v48 = vclamps-f32 %v824_v0, 1.0 }
 0x12c   : > { %v653_v58 = vmul.f32 %v1182_v43, %v652_v1 }
 0x12d   : > { %v834_v39 = vadd.f32 1.0, %v1068_v48 }
 0x12e   : > { %v654_v55 = vadd.f32 %v1182_v43, %v653_v58 }
 0x12f   : > { %v842_v42 = vmul.f32 %v834_v39, %v498_v10 }
 0x130   : > { %v658_v47 = vsel %vm657_vm11, %v1182_v43, %v654_v55 }
 0x131   : > { %1076 = vmatmul.msk.f32.gmra.mxu2 %vm259_vm0, %v842_v42  ;;  %1084 = vmatmul.msk.f32.gmra.mxu3 %vm259_vm0, %v842_v42  ;;  %v663_v52 = vsel %vm660_vm12, %v662_v16, %v658_v47 }
 0x132   : > { %v664_v54 = vmul.f32 %v663_v52, %v639_v53 }
 0x134   : > { %v1064_v31 = vclamps-f32 %v664_v54, 1.0 }
 0x136   : > { %v830_v12 = vadd.f32 1.0, %v1064_v31 }
 0x138   : > { %v838_v34 = vmul.f32 %v830_v12, %v494_v56 }
 0x13a   : > { %1072 = vmatmul.msk.f32.gmra.mxu0 %vm259_vm0, %v838_v34  ;;  %1080 = vmatmul.msk.f32.gmra.mxu1 %vm259_vm0, %v838_v34 }
 0x171   : > { %v898_v38 = vpop.f32.mrf.mxu0  ;;  %v939_v11 = vpop.f32.mrf.mxu1 }
 0x172   : > { %v899_v20 = vadd.f32 %v898_v38, %v853_v2  ;;  %v940_v18 = vadd.f32 %v939_v11, %v854_v5 }
 0x174   : > { %963 = vst [vmem:[%s1942_s16] sm:$0xff] %v899_v20 }
 0x175   : > { %1085 = vst [vmem:[%s1942_s16 + $0x10] sm:$0xff] %v940_v18 }
 0x180   : > { %v910_v40 = vpop.f32.mrf.mxu2  ;;  %v951_v37 = vpop.f32.mrf.mxu3 }
 0x181   : > { %v911_v36 = vadd.f32 %v910_v40, %v853_v2  ;;  %v952_v51 = vadd.f32 %v951_v37, %v854_v5 }
 0x183   : > { %967 = vst [vmem:[%s1942_s16 + $0x40] sm:$0xff] %v911_v36 }
 0x184   : > { %1089 = vst [vmem:[%s1942_s16 + $0x50] sm:$0xff] %v952_v51 }
 0x188   : > { %v913_v35 = vpop.f32.mrf.mxu2  ;;  %v954_v57 = vpop.f32.mrf.mxu3 }
 0x189   : > { %v914_v63 = vadd.f32 %v913_v35, %v853_v2  ;;  %v955_v21 = vadd.f32 %v954_v57, %v854_v5 }
 0x18b   : > { %968 = vst [vmem:[%s1942_s16 + $0x48] sm:$0xff] %v914_v63 }
 0x18c   : > { %1090 = vst [vmem:[%s1942_s16 + $0x58] sm:$0xff] %v955_v21 }
 0x18d   : > { %v901_v8 = vpop.f32.mrf.mxu0  ;;  %v942_v32 = vpop.f32.mrf.mxu1 }
 0x18e   : > { %v902_v61 = vadd.f32 %v901_v8, %v853_v2  ;;  %v943_v14 = vadd.f32 %v942_v32, %v854_v5 }
 0x190   : > { %964 = vst [vmem:[%s1942_s16 + $0x8] sm:$0xff] %v902_v61 }
 0x191   : > { %1086 = vst [vmem:[%s1942_s16 + $0x18] sm:$0xff] %v943_v14 }
 0x19e   : > { %v916_v15 = vpop.f32.mrf.mxu2  ;;  %v957_v45 = vpop.f32.mrf.mxu3 }
 0x19f   : > { %v917_v24 = vadd.f32 %v916_v15, %v853_v2  ;;  %v958_v26 = vadd.f32 %v957_v45, %v854_v5 }
 0x1a1   : > { %969 = vst [vmem:[%s1942_s16 + $0x60] sm:$0xff] %v917_v24 }
 0x1a2   : > { %1091 = vst [vmem:[%s1942_s16 + $0x70] sm:$0xff] %v958_v26 }
 0x1a4   : > { %v904_v17 = vpop.f32.mrf.mxu0  ;;  %v945_v9 = vpop.f32.mrf.mxu1 }
 0x1a5   : > { %v905_v6 = vadd.f32 %v904_v17, %v853_v2  ;;  %v946_v59 = vadd.f32 %v945_v9, %v854_v5 }
 0x1a7   : > { %965 = vst [vmem:[%s1942_s16 + $0x20] sm:$0xff] %v905_v6 }
 0x1a8   : > { %1087 = vst [vmem:[%s1942_s16 + $0x30] sm:$0xff] %v946_v59 }
 0x1b4   : > { %v919_v25 = vpop.f32.mrf.mxu2  ;;  %v960_v23 = vpop.f32.mrf.mxu3 }
 0x1b5   : > { %v920_v44 = vadd.f32 %v919_v25, %v853_v2  ;;  %v961_v41 = vadd.f32 %v960_v23, %v854_v5 }
 0x1b7   : > { %970 = vst [vmem:[%s1942_s16 + $0x68] sm:$0xff] %v920_v44  ;;  %v907_v30 = vpop.f32.mrf.mxu0  ;;  %v948_v29 = vpop.f32.mrf.mxu1 }
 0x1b8   : > { %1092 = vst [vmem:[%s1942_s16 + $0x78] sm:$0xff] %v961_v41  ;;  %v908_v27 = vadd.f32 %v907_v30, %v853_v2  ;;  %v949_v33 = vadd.f32 %v948_v29, %v854_v5 }
 0x1ba   : > { %966 = vst [vmem:[%s1942_s16 + $0x28] sm:$0xff] %v908_v27 }
 0x1bb   : > { %1088 = vst [vmem:[%s1942_s16 + $0x38] sm:$0xff] %v949_v33 }
 0x1bc PF: > { %p15_p7 = scmp.ge.s32.totalorder %s1302_s23, 10   ;;  %s2000_s18 = smov %s1239_s19 }
 0x1bd   : > { %s2001_s19 = smov %s1243_s20  ;;  %s2002_s20 = smov %s1312_s26 }
 0x1be   : > { %s2003_s21 = smov %s1302_s23  ;;  %17 = sbr.rel (!%p15_p7) target bundleno = 3 (0x3), region = 81 }
 0x1c3   :  { %1004 = vsyncpa [#allocation3], 1 }
 0x1c4   :  { %1006 = vsyncpa [#allocation3 + $0x1], 1 }

</bundles_post_ra>
